<compile_context>
chip_gen: v7x
topology: tpu7x:2x2x1
jax: 0.10.0
libtpu: 0.0.40
codegen_flags: <defaults>
</compile_context>

<pallas_src>
import jax
import jax.numpy as jnp
from jax.experimental import pallas as pl
from jax.experimental.pallas import tpu as pltpu


def _sigmoid(x):
    # tanh lowers to the EUP (its own VLIW slot); the remaining mul/add are cheap
    # VPU ops.  Avoids the f32 divide of 1/(1+exp(-x)) on the likely-binding VALU.
    return 0.5 * (jnp.tanh(0.5 * x) + 1.0)


def _lau_kernel(q_ref, ub_ref, wq_ref, w_ubp_ref, b1_ref, w2_ref, b2_ref,
                w3t_ref, b3_ref, out_ref):
    # q_ref:     (Bblk, 1, E)   f32 queries for this batch block
    # ub_ref:    (Bblk, Tp, E)  f32 behavior sequences (Tp = T padded to 8)
    # wq_ref:    (E, H1)   bf16  query-term weights (Wq + Wdiff)
    # w_ubp_ref: (2E, H1)  bf16  [Wub - Wdiff ; Wprod] merged layer-1 weights
    # b1_ref: (1,H1) f32, w2_ref: (H1,H2) bf16, b2_ref: (1,H2) f32
    # w3t_ref: (1,H2) f32, b3_ref: (1,1) f32
    # out_ref: (1, 1, Bblk*Tp)  lane-dense score slab for this grid step
    Bblk, Tp, E = ub_ref.shape
    H1 = b1_ref.shape[-1]
    H2 = b2_ref.shape[-1]

    q = q_ref[...].reshape(Bblk, E)                       # (Bblk, E) f32
    ub = ub_ref[...]                                      # (Bblk, Tp, E) f32

    # ---- Layer 1: single K=2E MXU push (concat removed algebraically) -------
    #   [q, ub, q-ub, q*ub] @ W1
    #     = q@(Wq+Wdiff) + [ub, q*ub] @ [Wub-Wdiff ; Wprod]
    lhs = jnp.concatenate([ub, ub * q[:, None, :]], axis=-1)        # (Bblk,Tp,2E)
    lhs2 = lhs.reshape(Bblk * Tp, 2 * E).astype(jnp.bfloat16)
    z1 = jnp.dot(lhs2, w_ubp_ref[...],
                 preferred_element_type=jnp.float32).reshape(Bblk, Tp, H1)

    # Query-dependent term (constant over T): one tiny (Bblk,E)@(E,H1) matmul,
    # added with an implicit broadcast — no materialized (Bblk*Tp, H1) slab.
    qterm = (jnp.dot(q.astype(jnp.bfloat16), wq_ref[...],
                     preferred_element_type=jnp.float32) + b1_ref[...])
    h1 = _sigmoid(z1 + qterm[:, None, :])                 # (Bblk, Tp, H1) f32

    # ---- Layer 2 -------------------------------------------------------------
    z2 = (jnp.dot(h1.reshape(Bblk * Tp, H1).astype(jnp.bfloat16), w2_ref[...],
                  preferred_element_type=jnp.float32) + b2_ref[...])
    h2 = _sigmoid(z2)                                     # (Bblk*Tp, H2) f32

    # ---- Final (H2 -> 1) dense: VPU multiply + lane reduction (no N=1 MXU) ---
    score = jnp.sum(h2.reshape(Bblk, Tp, H2) * w3t_ref[...], axis=-1) + b3_ref[...]
    # One (Bblk,Tp) -> (1, Bblk*Tp) relayout, then a contiguous unmasked store.
    out_ref[...] = score.reshape(1, 1, Bblk * Tp).astype(out_ref.dtype)


# ----------------------------- block-size planning ---------------------------

# Per-row VMEM cost estimate (lane-padded to 128, f32-dominated):
#   ub block x2 (double buffer) + lhs(bf16) + z1/h1 + h1(bf16) + z2/h2 temps.
_BYTES_PER_ROW = 8 * 128 * 4
_FIXED_BYTES = 2 << 20          # resident weights/biases, output blocks, headroom


def _vmem_budget_bytes():
    """Scoped-VMEM budget that fits every generation with headroom.
    v5e/v6e: 128 MiB physical (scoped defaults 16/32 MiB); v7x: 64 MiB."""
    try:
        phys = int(pltpu.get_tpu_info().vmem_capacity_bytes)
    except Exception:
        phys = 64 << 20          # assume the smallest (v7x) if the query fails
    return int(min(phys // 2, 32 << 20))


def _choose_bblk(B, Tp, vmem_budget):
    """Pick a batch block so Bblk*Tp amortizes per-step overhead, fits the VMEM
    budget, Bblk divides B, and (for v7x's two TensorCores) the grid keeps >=2
    steps, preferring an even step count."""
    max_rows = max(Tp, (vmem_budget - _FIXED_BYTES) // _BYTES_PER_ROW)
    target_rows = min(4096, max_rows)
    want = max(1, min(B, max(1, target_rows // max(Tp, 1))))
    if B > 1:
        want = min(want, max(1, B // 2))      # never collapse to grid=(1,)
    best = 1
    for d in range(want, 0, -1):
        if B % d == 0:
            if (B // d) % 2 == 0:             # even step count: balanced cores
                return d
            if best == 1:
                best = d
    return best


# --------------------------------- wrapper ------------------------------------

def local_activation_unit(query, user_behavior, params):
    """query: (B, 1, E), user_behavior: (B, T, E) -> (B, T, 1)"""
    B, one, E = query.shape
    assert one == 1
    Bu, T, E2 = user_behavior.shape
    assert Bu == B and E2 == E

    w1, b1, w2, b2, w3, b3 = params
    assert w1.shape[0] == 4 * E
    H1 = w1.shape[1]
    H2 = w2.shape[1]

    # Algebraic removal of the lane-axis concat + merged layer-1 weight:
    #   [q, ub, q-ub, q*ub] @ W1 = q@(Wq+Wdiff) + [ub, q*ub] @ [Wub-Wdiff ; Wprod]
    wq = (w1[0:E] + w1[2 * E:3 * E]).astype(jnp.bfloat16)            # (E, H1)
    w_ubp = jnp.concatenate([w1[E:2 * E] - w1[2 * E:3 * E],
                             w1[3 * E:4 * E]], axis=0).astype(jnp.bfloat16)  # (2E, H1)
    b1r = b1.reshape(1, H1).astype(jnp.float32)
    w2b = w2.astype(jnp.bfloat16)
    b2r = b2.reshape(1, H2).astype(jnp.float32)
    w3t = w3.reshape(1, H2).astype(jnp.float32)
    b3r = b3.reshape(1, 1).astype(jnp.float32)

    # Pad T to a multiple of 8: layout-free in-kernel reshapes, aligned M dim.
    Tp = ((T + 7) // 8) * 8
    if Tp != T:
        user_behavior = jnp.pad(user_behavior,
                                ((0, 0), (0, Tp - T), (0, 0)))

    vmem_budget = _vmem_budget_bytes()
    Bblk = _choose_bblk(B, Tp, vmem_budget)
    G = B // Bblk

    def _const_spec(a):
        nd = a.ndim
        return pl.BlockSpec(a.shape, lambda i, _nd=nd: (0,) * _nd)

    out = pl.pallas_call(
        _lau_kernel,
        out_shape=jax.ShapeDtypeStruct((G, 1, Bblk * Tp), query.dtype),
        grid_spec=pltpu.PrefetchScalarGridSpec(
            num_scalar_prefetch=0,
            grid=(G,),
            in_specs=[
                pl.BlockSpec((Bblk, 1, E), lambda i: (i, 0, 0)),     # query block
                pl.BlockSpec((Bblk, Tp, E), lambda i: (i, 0, 0)),    # behavior block
                _const_spec(wq), _const_spec(w_ubp), _const_spec(b1r),
                _const_spec(w2b), _const_spec(b2r),
                _const_spec(w3t), _const_spec(b3r),
            ],
            out_specs=pl.BlockSpec((1, 1, Bblk * Tp), lambda i: (i, 0, 0)),
        ),
        compiler_params=pltpu.CompilerParams(
            dimension_semantics=("parallel",),
            vmem_limit_bytes=vmem_budget),
    )(query, user_behavior, wq, w_ubp, b1r, w2b, b2r, w3t, b3r)

    # (G, 1, Bblk*Tp) flattens in the same linear order as (B, Tp) -> reshape,
    # then drop the padded sequence tail.
    out = out.reshape(B, Tp, 1)[:, :T, :]
    return out


# ----------------------------- reference & params ------------------------------

def init_params(key, embedding_dim=4, hidden_units=(64, 32), init_std=1e-4):
    """Deterministic synthetic params mirroring the PyTorch module's shapes.

    DNN linear weights ~ N(0, init_std) (as in DNN.__init__); biases and the
    final dense layer use small deterministic random values.
    """
    in_dim = 4 * embedding_dim
    H1, H2 = hidden_units
    k = jax.random.split(key, 6)
    w1 = jax.random.normal(k[0], (in_dim, H1), jnp.float32) * init_std
    b1 = jax.random.uniform(k[1], (1, H1), jnp.float32, -0.1, 0.1)
    w2 = jax.random.normal(k[2], (H1, H2), jnp.float32) * init_std
    b2 = jax.random.uniform(k[3], (1, H2), jnp.float32, -0.1, 0.1)
    w3 = jax.random.normal(k[4], (H2, 1), jnp.float32) * 0.1
    b3 = jax.random.uniform(k[5], (1, 1), jnp.float32, -0.1, 0.1)
    return (w1, b1, w2, b2, w3, b3)


def reference(query, user_behavior, params):
    """Pure-JAX reference of LocalActivationUnit.forward (no bn, no dropout)."""
    w1, b1, w2, b2, w3, b3 = params
    T = user_behavior.shape[1]
    hp = jax.lax.Precision.HIGHEST
    qe = jnp.broadcast_to(query, (query.shape[0], T, query.shape[2]))
    x = jnp.concatenate(
        [qe, user_behavior, qe - user_behavior, qe * user_behavior], axis=-1)
    h1 = jax.nn.sigmoid(jnp.dot(x, w1, precision=hp) + b1)
    h2 = jax.nn.sigmoid(jnp.dot(h1, w2, precision=hp) + b2)
    return jnp.dot(h2, w3, precision=hp) + b3


if __name__ == "__main__":
    B, T, E = 2, 8, 4          # embedding_dim=4 (module default), batch=2, seq=8
    key = jax.random.PRNGKey(0)
    kq, kub, kp = jax.random.split(key, 3)

    query = jax.random.normal(kq, (B, 1, E), jnp.float32)
    user_behavior = jax.random.normal(kub, (B, T, E), jnp.float32)
    params = init_params(kp, embedding_dim=E, hidden_units=(64, 32))

    out = local_activation_unit(query, user_behavior, params)
    out = jax.block_until_ready(out)

    ref = reference(query, user_behavior, params)
    assert out.shape == (B, T, 1)
    # bf16 MXU operands + EUP tanh-sigmoid -> slightly looser than pure-f32.
    assert jnp.allclose(out, ref, atol=2e-3, rtol=2e-3), \
        float(jnp.max(jnp.abs(out - ref)))

    print("KERNEL_OK")
</pallas_src>

<mosaic_0001>
module attributes {stable_mosaic.version = 11 : i64} {
  func.func @_lau_kernel(%arg0: i32, %arg1: memref<1x1x4xf32, #tpu.memory_space<vmem>>, %arg2: memref<1x8x4xf32, #tpu.memory_space<vmem>>, %arg3: memref<4x64xbf16, #tpu.memory_space<vmem>>, %arg4: memref<8x64xbf16, #tpu.memory_space<vmem>>, %arg5: memref<1x64xf32, #tpu.memory_space<vmem>>, %arg6: memref<64x32xbf16, #tpu.memory_space<vmem>>, %arg7: memref<1x32xf32, #tpu.memory_space<vmem>>, %arg8: memref<1x32xf32, #tpu.memory_space<vmem>>, %arg9: memref<1x1xf32, #tpu.memory_space<vmem>>, %arg10: memref<1x1x8xf32, #tpu.memory_space<vmem>>) attributes {dimension_semantics = [#tpu.dimension_semantics<parallel>], iteration_bounds = array<i64: 2>, scalar_prefetch = 0 : i64, scratch_operands = 0 : i64, tpu.core_type = #tpu.core_type<tc>, window_params = [{transform_indices = @transform_0, window_bounds = array<i64: 1, 1, 4>}, {transform_indices = @transform_1, window_bounds = array<i64: 1, 8, 4>}, {pipeline_mode = #tpu.pipeline_mode<synchronous>, transform_indices = @transform_2, window_bounds = array<i64: 4, 64>}, {pipeline_mode = #tpu.pipeline_mode<synchronous>, transform_indices = @transform_3, window_bounds = array<i64: 8, 64>}, {pipeline_mode = #tpu.pipeline_mode<synchronous>, transform_indices = @transform_4, window_bounds = array<i64: 1, 64>}, {pipeline_mode = #tpu.pipeline_mode<synchronous>, transform_indices = @transform_5, window_bounds = array<i64: 64, 32>}, {pipeline_mode = #tpu.pipeline_mode<synchronous>, transform_indices = @transform_6, window_bounds = array<i64: 1, 32>}, {pipeline_mode = #tpu.pipeline_mode<synchronous>, transform_indices = @transform_7, window_bounds = array<i64: 1, 32>}, {pipeline_mode = #tpu.pipeline_mode<synchronous>, transform_indices = @transform_8, window_bounds = array<i64: 1, 1>}, {transform_indices = @transform_9, window_bounds = array<i64: 1, 1, 8>}]} {
    %c0 = arith.constant 0 : index
    %c0_0 = arith.constant 0 : index
    %c0_1 = arith.constant 0 : index
    %0 = vector.load %arg1[%c0, %c0_0, %c0_1] : memref<1x1x4xf32, #tpu.memory_space<vmem>>, vector<1x1x4xf32>
    %1 = vector.shape_cast %0 : vector<1x1x4xf32> to vector<1x4xf32>
    %c0_2 = arith.constant 0 : index
    %c0_3 = arith.constant 0 : index
    %c0_4 = arith.constant 0 : index
    %2 = vector.load %arg2[%c0_2, %c0_3, %c0_4] : memref<1x8x4xf32, #tpu.memory_space<vmem>>, vector<1x8x4xf32>
    %3 = vector.shape_cast %1 : vector<1x4xf32> to vector<1x1x4xf32>
    %4 = vector.broadcast %3 : vector<1x1x4xf32> to vector<1x8x4xf32>
    %5 = arith.mulf %2, %4 : vector<1x8x4xf32>
    %6 = tpu.concatenate %2, %5 in 2 : vector<1x8x4xf32>, vector<1x8x4xf32> -> vector<1x8x8xf32>
    %7 = vector.shape_cast %6 : vector<1x8x8xf32> to vector<8x8xf32>
    %8 = arith.truncf %7 : vector<8x8xf32> to vector<8x8xbf16>
    %c0_5 = arith.constant 0 : index
    %c0_6 = arith.constant 0 : index
    %9 = vector.load %arg4[%c0_5, %c0_6] : memref<8x64xbf16, #tpu.memory_space<vmem>>, vector<8x64xbf16>
    %cst = arith.constant dense<0.000000e+00> : vector<8x64xf32>
    %10 = tpu.matmul %8, %9, %cst {dimension_numbers = #tpu.dot_dimension_numbers<[1], [0], [0], [1], [0, 0, 1, 1], [], []>} : vector<8x8xbf16>, vector<8x64xbf16>, vector<8x64xf32> -> vector<8x64xf32>
    %11 = vector.shape_cast %10 : vector<8x64xf32> to vector<1x8x64xf32>
    %12 = arith.truncf %1 : vector<1x4xf32> to vector<1x4xbf16>
    %c0_7 = arith.constant 0 : index
    %c0_8 = arith.constant 0 : index
    %13 = vector.load %arg3[%c0_7, %c0_8] : memref<4x64xbf16, #tpu.memory_space<vmem>>, vector<4x64xbf16>
    %cst_9 = arith.constant dense<0.000000e+00> : vector<1x64xf32>
    %14 = tpu.matmul %12, %13, %cst_9 {dimension_numbers = #tpu.dot_dimension_numbers<[1], [0], [0], [1], [0, 0, 1, 1], [], []>} : vector<1x4xbf16>, vector<4x64xbf16>, vector<1x64xf32> -> vector<1x64xf32>
    %c0_10 = arith.constant 0 : index
    %c0_11 = arith.constant 0 : index
    %15 = vector.load %arg5[%c0_10, %c0_11] : memref<1x64xf32, #tpu.memory_space<vmem>>, vector<1x64xf32>
    %16 = arith.addf %14, %15 : vector<1x64xf32>
    %17 = vector.shape_cast %16 : vector<1x64xf32> to vector<1x1x64xf32>
    %18 = vector.broadcast %17 : vector<1x1x64xf32> to vector<1x8x64xf32>
    %19 = arith.addf %11, %18 : vector<1x8x64xf32>
    %cst_12 = arith.constant 5.000000e-01 : f32
    %20 = vector.broadcast %cst_12 : f32 to vector<1x8x64xf32>
    %21 = arith.mulf %20, %19 : vector<1x8x64xf32>
    %22 = math.tanh %21 : vector<1x8x64xf32>
    %cst_13 = arith.constant 1.000000e+00 : f32
    %23 = vector.broadcast %cst_13 : f32 to vector<1x8x64xf32>
    %24 = arith.addf %22, %23 : vector<1x8x64xf32>
    %cst_14 = arith.constant 5.000000e-01 : f32
    %25 = vector.broadcast %cst_14 : f32 to vector<1x8x64xf32>
    %26 = arith.mulf %25, %24 : vector<1x8x64xf32>
    %27 = vector.shape_cast %26 : vector<1x8x64xf32> to vector<8x64xf32>
    %28 = arith.truncf %27 : vector<8x64xf32> to vector<8x64xbf16>
    %c0_15 = arith.constant 0 : index
    %c0_16 = arith.constant 0 : index
    %29 = vector.load %arg6[%c0_15, %c0_16] : memref<64x32xbf16, #tpu.memory_space<vmem>>, vector<64x32xbf16>
    %cst_17 = arith.constant dense<0.000000e+00> : vector<8x32xf32>
    %30 = tpu.matmul %28, %29, %cst_17 {dimension_numbers = #tpu.dot_dimension_numbers<[1], [0], [0], [1], [0, 0, 1, 1], [], []>} : vector<8x64xbf16>, vector<64x32xbf16>, vector<8x32xf32> -> vector<8x32xf32>
    %c0_18 = arith.constant 0 : index
    %c0_19 = arith.constant 0 : index
    %31 = vector.load %arg7[%c0_18, %c0_19] : memref<1x32xf32, #tpu.memory_space<vmem>>, vector<1x32xf32>
    %32 = vector.broadcast %31 : vector<1x32xf32> to vector<8x32xf32>
    %33 = arith.addf %30, %32 : vector<8x32xf32>
    %cst_20 = arith.constant 5.000000e-01 : f32
    %34 = vector.broadcast %cst_20 : f32 to vector<8x32xf32>
    %35 = arith.mulf %34, %33 : vector<8x32xf32>
    %36 = math.tanh %35 : vector<8x32xf32>
    %cst_21 = arith.constant 1.000000e+00 : f32
    %37 = vector.broadcast %cst_21 : f32 to vector<8x32xf32>
    %38 = arith.addf %36, %37 : vector<8x32xf32>
    %cst_22 = arith.constant 5.000000e-01 : f32
    %39 = vector.broadcast %cst_22 : f32 to vector<8x32xf32>
    %40 = arith.mulf %39, %38 : vector<8x32xf32>
    %41 = vector.shape_cast %40 : vector<8x32xf32> to vector<1x8x32xf32>
    %c0_23 = arith.constant 0 : index
    %c0_24 = arith.constant 0 : index
    %42 = vector.load %arg8[%c0_23, %c0_24] : memref<1x32xf32, #tpu.memory_space<vmem>>, vector<1x32xf32>
    %43 = vector.shape_cast %42 : vector<1x32xf32> to vector<1x1x32xf32>
    %44 = vector.broadcast %43 : vector<1x1x32xf32> to vector<1x8x32xf32>
    %45 = arith.mulf %41, %44 : vector<1x8x32xf32>
    %cst_25 = arith.constant dense<0.000000e+00> : vector<1x8xf32>
    %46 = vector.multi_reduction <add>, %45, %cst_25 [2] : vector<1x8x32xf32> to vector<1x8xf32>
    %c0_26 = arith.constant 0 : index
    %c0_27 = arith.constant 0 : index
    %47 = vector.load %arg9[%c0_26, %c0_27] : memref<1x1xf32, #tpu.memory_space<vmem>>, vector<1x1xf32>
    %48 = vector.broadcast %47 : vector<1x1xf32> to vector<1x8xf32>
    %49 = arith.addf %46, %48 : vector<1x8xf32>
    %50 = vector.shape_cast %49 : vector<1x8xf32> to vector<1x1x8xf32>
    %c0_28 = arith.constant 0 : index
    %c0_29 = arith.constant 0 : index
    %c0_30 = arith.constant 0 : index
    %51 = vector.load %arg10[%c0_28, %c0_29, %c0_30] : memref<1x1x8xf32, #tpu.memory_space<vmem>>, vector<1x1x8xf32>
    tpu.vector_store %arg10[%c0_28, %c0_29, %c0_30], %50 {strides = array<i32>} : memref<1x1x8xf32, #tpu.memory_space<vmem>>, vector<1x1x8xf32>,
    return
  }
  func.func @transform_0(%arg0: i32) -> (i32, i32, i32) {
    %c0_i32 = arith.constant 0 : i32
    %c0_i32_0 = arith.constant 0 : i32
    %c0_i32_1 = arith.constant 0 : i32
    return %arg0, %c0_i32, %c0_i32_0 : i32, i32, i32
  }
  func.func @transform_1(%arg0: i32) -> (i32, i32, i32) {
    %c0_i32 = arith.constant 0 : i32
    %c0_i32_0 = arith.constant 0 : i32
    %c0_i32_1 = arith.constant 0 : i32
    return %arg0, %c0_i32, %c0_i32_0 : i32, i32, i32
  }
  func.func @transform_2(%arg0: i32) -> (i32, i32) {
    %c0_i32 = arith.constant 0 : i32
    %c0_i32_0 = arith.constant 0 : i32
    %c0_i32_1 = arith.constant 0 : i32
    return %c0_i32, %c0_i32_0 : i32, i32
  }
  func.func @transform_3(%arg0: i32) -> (i32, i32) {
    %c0_i32 = arith.constant 0 : i32
    %c0_i32_0 = arith.constant 0 : i32
    %c0_i32_1 = arith.constant 0 : i32
    return %c0_i32, %c0_i32_0 : i32, i32
  }
  func.func @transform_4(%arg0: i32) -> (i32, i32) {
    %c0_i32 = arith.constant 0 : i32
    %c0_i32_0 = arith.constant 0 : i32
    %c0_i32_1 = arith.constant 0 : i32
    return %c0_i32, %c0_i32_0 : i32, i32
  }
  func.func @transform_5(%arg0: i32) -> (i32, i32) {
    %c0_i32 = arith.constant 0 : i32
    %c0_i32_0 = arith.constant 0 : i32
    %c0_i32_1 = arith.constant 0 : i32
    return %c0_i32, %c0_i32_0 : i32, i32
  }
  func.func @transform_6(%arg0: i32) -> (i32, i32) {
    %c0_i32 = arith.constant 0 : i32
    %c0_i32_0 = arith.constant 0 : i32
    %c0_i32_1 = arith.constant 0 : i32
    return %c0_i32, %c0_i32_0 : i32, i32
  }
  func.func @transform_7(%arg0: i32) -> (i32, i32) {
    %c0_i32 = arith.constant 0 : i32
    %c0_i32_0 = arith.constant 0 : i32
    %c0_i32_1 = arith.constant 0 : i32
    return %c0_i32, %c0_i32_0 : i32, i32
  }
  func.func @transform_8(%arg0: i32) -> (i32, i32) {
    %c0_i32 = arith.constant 0 : i32
    %c0_i32_0 = arith.constant 0 : i32
    %c0_i32_1 = arith.constant 0 : i32
    return %c0_i32, %c0_i32_0 : i32, i32
  }
  func.func @transform_9(%arg0: i32) -> (i32, i32, i32) {
    %c0_i32 = arith.constant 0 : i32
    %c0_i32_0 = arith.constant 0 : i32
    %c0_i32_1 = arith.constant 0 : i32
    return %arg0, %c0_i32, %c0_i32_0 : i32, i32, i32
  }
}

</mosaic_0001>

<bundles_post_ra>
// kernel: tpu_custom_call.1
= control target key start
LH: loop header
LB: loop body
LE: loop exit
PB: predicated region body
PF: predicated region fallthrough
CT: control target
= control target key end

     0   :  { %s1035_s0 = inlined_call_operand.vmem [shape: f32[2,1,4], index: 0, kind: input, shape index: {}]   ;;  %s1036_s1 = inlined_call_operand.vmem [shape: f32[2,8,4], index: 1, kind: input, shape index: {}]   ;;  %s1037_s2 = inlined_call_operand.vmem [shape: bf16[4,64], index: 2, kind: input, shape index: {}]   ;;  %s1038_s3 = inlined_call_operand.vmem [shape: bf16[8,64], index: 3, kind: input, shape index: {}]   ;;  %s1039_s4 = inlined_call_operand.vmem [shape: f32[1,64], index: 4, kind: input, shape index: {}]   ;;  %s1040_s5 = inlined_call_operand.vmem [shape: bf16[64,32], index: 5, kind: input, shape index: {}]   ;;  %s1041_s6 = inlined_call_operand.vmem [shape: f32[1,32], index: 6, kind: input, shape index: {}]   ;;  %s1042_s7 = inlined_call_operand.vmem [shape: f32[1,32], index: 7, kind: input, shape index: {}]   ;;  %s1043_s8 = inlined_call_operand.<no memory space> [shape: f32[1,1], index: 8, kind: input, shape index: {}]   ;;  %s1044_s9 = inlined_call_operand.hbm [shape: f32[2,1,8], index: 9, kind: output, shape index: {}]  }
   0x1   :  { %v14_v0 = vstv %s1043_s8 }
   0x2   :  { %15 = vst [vmem:[#allocation2] sm:$0x1] %v14_v0 }
   0x3   :  { %16 = vsyncpa [#allocation4], 0 }
   0x4   :  { %18 = vsyncpa [#allocation4 + $0x1], 0  ;;  %s891_s11 = smov 0   ;;  %s893_s12 = smov 0  }
   0x5   :  { %s895_s13 = smov 0   ;;  %s897_s14 = smov 0  }
   0x6 LB: > { %s912_s8 = sadd.s32 4294967295, %s831_s14   ;;  %s666_s15 = sadd.s32 4294967294, %s831_s14   ;;  %s831_s14 = sphi %s897_s14, %s1050_s14   ;;  %s827_s13 = sphi %s895_s13, %s1049_s13   ;;  %s823_s12 = sphi %s893_s12, %s1048_s12   ;;  %s819_s11 = sphi %s891_s11, %s1047_s11  }
   0x7   : > { %s916_s16 = sadd.s32 1, %s831_s14   ;;  %s230_s17 = sadd.s32 1, %s827_s13 }
   0x8   : > { %s227_s18 = ssub.s32 %s831_s14, %s916_s16  ;;  %p240_p0 = scmp.ne.s32.totalorder %s827_s13, %s823_s12 }
   0x9   : > { %p228_p1 = scmp.eq.s32.totalorder %s227_s18, 0  ;;  %p241_p2 = scmp.eq.s32.totalorder %s912_s8, 1 }
   0xa   : > { %p246_p3 = scmp.ne.s32.totalorder %s823_s12, %s819_s11  ;;  %p247_p4 = scmp.eq.s32.totalorder %s666_s15, 1 }
   0xb   : > { %s927_s19 = scalar_select %p228_p1, %s827_s13, %s230_s17  }
   0xc   : > { %p929_p5 = por %p241_p2, %p240_p0  ;;  %p933_p6 = por %p247_p4, %p246_p3 }
   0xd   : > { %p669_p7 = scmp.ge.s32.totalorder %s831_s14, 1  ;;  %p299_p8 = scmp.lt.s32.totalorder %s831_s14, 3 }
   0xf   : > { %p300_p9 = pnand %p669_p7, %p299_p8 }
  0x10   : > { %p336_p10 = scmp.lt.s32.totalorder (!%p300_p9), %s912_s8, 1  ;;  %v347_v1 = vlaneseq (!%p300_p9)  ;;  %v360_v2 = vld [vmem:[%s1038_s3] sm:$0xf] (!%p300_p9)  ;;  %vm365_vm0 = vcmask (!%p300_p9), 1043456   ;;  %v833_v3 = vmov (!%p300_p9), 0.0   ;;  %vm834_vm1 = vmmov (!%p300_p9), 0  }
  0x11   : > { %303 = sbr.rel (%p300_p9) target bundleno = 789 (0x315), region = 56  ;;  %692 = vmatprep.subr.bf16.mxu1 (!%p300_p9), %v833_v3  ;;  %v367_v4 = vsel (!%p300_p9), %vm365_vm0, %v360_v2, 0  ;;  %704 = vmatprep.subr.bf16.mxu0 (!%p300_p9), %v833_v3  ;;  %s835_s15 = smov (!%p300_p9), 4   ;;  %vm357_vm2 = vcmask (!%p300_p9), 31744   ;;  %v410_v11 = vld [vmem:[%s1037_s2] sm:$0x3] (!%p300_p9) }
  0x12   : > { %v945_v5 = vshrl.u32 (!%p300_p9), %v347_v1, 7  ;;  %693 = vmatpush3.bf16.msra.mxu1 (!%p300_p9), %v367_v4  ;;  %694 = vmatprep.mubr.msk.bf16.mxu1 (!%p300_p9), %vm834_vm1, %v833_v3  ;;  %vm415_vm3 = vcmask (!%p300_p9), 1041408   ;;  %vm361_vm4 = vcmask (!%p300_p9), 64512   ;;  %v761_v17 = vld [vmem:[%s1040_s5] sm:$0xff] (!%p300_p9)   ;;  %v762_v18 = vld [vmem:[%s1040_s5 + $0x8] sm:$0xff] (!%p300_p9)   ;;  %v763_v19 = vld [vmem:[%s1040_s5 + $0x10] sm:$0xff] (!%p300_p9)  }
  0x13   : > { %698 = vmatprep.subr.bf16.mxu1 (!%p300_p9), %v833_v3  ;;  %712 = vmatprep.mubr.msk.bf16.mxu0 (!%p300_p9), %vm834_vm1, %v833_v3  ;;  %v417_v15 = vsel (!%p300_p9), %vm415_vm3, %v410_v11, 0  ;;  %v764_v20 = vld [vmem:[%s1040_s5 + $0x18] sm:$0xff] (!%p300_p9)   ;;  %v411_v25 = vld [vmem:[%s1039_s4] sm:$0x1] (!%p300_p9)  ;;  %vm508_vm5 = vcmask (!%p300_p9), 523264   ;;  %v836_v39 = vmov (!%p300_p9), 0  }
  0x14   : > { %v953_v6 = vsub.s32 (!%p300_p9), 0, %v945_v5  ;;  %705 = vmatpush3.bf16.msra.mxu0 (!%p300_p9), %v761_v17  ;;  %v568_v38 = vld [vmem:[#allocation2] sm:$0x1] (!%p300_p9)  ;;  %759 = vset.pattern.permute.xlu1 (!%p300_p9), %v836_v39  ;;  %vm564_vm6 = vcmask (!%p300_p9), 261120   ;;  %s334_s23 = sand.u32 (!%p300_p9), 1, %s823_s12   ;;  %v581_v54 = vand.u32 (!%p300_p9), 127, %v347_v1 }
  0x15   : > { %706 = vmatprep.subr.bf16.mxu0 (!%p300_p9), %v833_v3  ;;  %760 = vset.pattern.permute.xlu0 (!%p300_p9), %v836_v39  ;;  %v673_v40 = vld [vmem:[%s1041_s6] ss:$0 sm:$0xff] (!%p300_p9)  ;;  %s335_s25 = scalar_lea.vmem (!%p300_p9), [#allocation3], %s334_s23  ;;  %vm587_vm7 = vcmask (!%p300_p9), 57344   ;;  %s590_s30 = scalar_lea.sflag (!%p300_p9), [#allocation4], %s334_s23 }
  0x16   : > { %571 = vperm.xlu1 (!%p300_p9), %759, %v568_v38   ;;  %v679_v49 = vld [vmem:[%s1042_s7] ss:$0 sm:$0xff] (!%p300_p9)  ;;  %v584_v56 = vsub.s32 (!%p300_p9), %v581_v54, %v945_v5  ;;  %s602_s26 = sshll.u32 (!%p300_p9), %s335_s25, 4  ;;  %s995_s26 = int_to_ptr.vmem [resolvable:$true] %s602_s26 }
  0x18   : > { %s337_s24 = scalar_select %p336_p10, %s912_s8, 1  ;;  %707 = vmatpush3.bf16.msra.mxu0 %v762_v18 }
  0x19   : > { %708 = vmatprep.subr.bf16.mxu0 %v833_v3 }
  0x1a   : > { %s338_s27 = scalar_lea.vmem %s1035_s0, %s337_s24  ;;  %s670_s28 = sshll.u32 %s337_s24, 3 }
  0x1b   : > { %s342_s10 = scalar_lea.vmem %s1036_s1, %s670_s28  ;;  %v344_v7 = vld [vmem:[%s338_s27] sm:$0x1]  ;;  %s680_s24 = sshll.u32 %s912_s8, 4 }
  0x1c   : > { %v345_v8 = vld [vmem:[%s342_s10] sm:$0xff]  ;;  %v350_v9 = vrot.slane %v344_v7, %v953_v6  ;;  %v409_v16 = vpack.c.bf16 %v344_v7, %v344_v7  ;;  %709 = vmatpush3.bf16.msra.mxu0 %v763_v19  ;;  %s993_s29 = scalar_lea.hbm %s1044_s9, %s680_s24  ;;  %s769_s10 = scalar_lea.vmem %s995_s26, 16 }
  0x1d   : > { %710 = vmatprep.subr.bf16.mxu0 %v833_v3  ;;  %p770_p11 = scmp.ne.s32.totalorder %s995_s26, %s769_s10  ;;  %s837_s8 = smov [#allocation3]  }
  0x1e   : > { %v352_v10 = vmul.f32 %v350_v9, %v345_v8 }
  0x1f   : > { %p771_p12 = pnand %p770_p11, %p929_p5 }
  0x20   : > { %354 = vrot.lane.b32.xlu0 %v352_v10, %s835_s15  ;;  %711 = vmatpush3.bf16.msra.mxu0 %v764_v20  ;;  %s773_s15 = sshll.u32 %s837_s8, 4  ;;  %s774_s15 = int_to_ptr.vmem [resolvable:$false] %s773_s15 }
  0x21   : > { %p772_p13 = pneg %p771_p12  ;;  %s775_s17 = scalar_lea.vmem %s774_s15, 32 }
  0x22   : > { %p776_p0 = scmp.lt.s32.totalorder %s995_s26, %s774_s15  ;;  %p777_p1 = scmp.lt.s32.totalorder %s775_s17, %s769_s10 }
  0x24   : > { %p778_p2 = por %p777_p1, %p776_p0 }
  0x26   : > { %p779_p3 = pnand %p778_p2, %p772_p13 }
  0x92   : > { %v355_v12 = vpop.permute.xlu0 %354 }
  0x93   : > { %v358_v13 = vsel %vm357_vm2, %v345_v8, %v355_v12 }
  0x94   : > { %v359_v14 = vpack.c.bf16 %v358_v13, %v358_v13 }
  0x95   : > { %v572_v53 = vpop.permute.xlu1 %571 }
  0x96   : > { %695 = vmatmul.mubr.msk.bf16.vlgmr.msra.gmra.mrb[0].mxu1 %vm361_vm4, %v359_v14  ;;  %v577_v55 = vrot.slane %v572_v53, %v953_v6 }
  0x97   : > { %699 = vmatpush3.bf16.msra.mxu1 %v417_v15  ;;  %700 = vmatprep.mubr.msk.bf16.mxu1 %vm834_vm1, %v833_v3 }
  0x9e   : > { %701 = vmatmul.mubr.msk.bf16.vlgmr.msra.gmra.mrb[4].mxu1 %vm357_vm2, %v409_v16 }
 0x169   : > { %v403_v21 = vpop.f32.mrb[0].mxu1 }
 0x16a   : > { %v696_v22 = vpop.f32.mrb[1].mxu1 }
 0x16b   : > { %v406_v23 = vpop.f32.mrb[2].mxu1 }
 0x16c   : > { %v697_v24 = vpop.f32.mrb[3].mxu1 }
 0x171   : > { %v453_v26 = vpop.f32.mrb[4].mxu1 }
 0x172   : > { %v454_v27 = vadd.f32 %v453_v26, %v411_v25  ;;  %v702_v28 = vpop.f32.mrb[5].mxu1 }
 0x173   : > { %v456_v29 = vpop.f32.mrb[6].mxu1 }
 0x174   : > { %v462_v30 = vrot.slane %v454_v27, %v953_v6  ;;  %v703_v31 = vpop.f32.mrb[7].mxu1 }
 0x176   : > { %v463_v32 = vadd.f32 %v462_v30, %v403_v21 }
 0x178   : > { %v464_v33 = vmul.f32 0.5, %v463_v32 }
 0x17a   : > { %765 = vtanh.f32 %v464_v33 }
 0x184   : > { %v766_v34 = vpop.eup %765 }
 0x185   : > { %v466_v35 = vadd.f32 1.0, %v766_v34 }
 0x187   : > { %v467_v36 = vmul.f32 0.5, %v466_v35 }
 0x189   : > { %v468_v37 = vpack.c.bf16 %v467_v36, %v467_v36 }
 0x18b   : > { %713 = vmatmul.mubr.msk.bf16.vlgmr.msra.gmra.mrb[0].mxu0 %vm508_vm5, %v468_v37 }
 0x25e   : > { %v546_v41 = vpop.f32.mrb[0].mxu0 }
 0x25f   : > { %v547_v42 = vadd.f32 %v673_v40, %v546_v41  ;;  %v714_v43 = vpop.f32.mrb[1].mxu0 }
 0x260   : > { %v549_v44 = vpop.f32.mrb[2].mxu0 }
 0x261   : > { %v552_v45 = vmul.f32 0.5, %v547_v42  ;;  %v715_v46 = vpop.f32.mrb[3].mxu0 }
 0x263   : > { %767 = vtanh.f32 %v552_v45 }
 0x26d   : > { %v768_v47 = vpop.eup %767 }
 0x26e   : > { %v554_v48 = vadd.f32 1.0, %v768_v47 }
 0x270   : > { %v555_v50 = vmul.f32 0.5, %v554_v48 }
 0x272   : > { %v563_v51 = vmul.f32 %v679_v49, %v555_v50 }
 0x274   : > { %v565_v52 = vsel %vm564_vm6, %v563_v51, 0.0 }
 0x275   : > { %566 = vadd.xlane.f32.xlu0 %v565_v52 }
 0x302   : > { %v567_v57 = vpop.xlane.xlu0 %566 }
 0x303   : > { %v578_v58 = vadd.f32 %v577_v55, %v567_v57 }
 0x305   : > { %v585_v59 = vrot.slane %v578_v58, %v584_v56 }
 0x307   : > { %588 = vst.msk [vmem:[%s335_s25] sm:$0x1] %vm587_vm7, %v585_v59 }
 0x308   : > { %782 = shalt.err (!%p779_p3)
}
 0x309   : > { %s783_s18 = scalar_lea.hbm %s993_s29, 16  ;;  %s787_s24 = scalar_lea.hbm %s1044_s9, 32 }
 0x30a   : > { %p784_p4 = scmp.ne.s32.totalorder %s993_s29, %s783_s18  ;;  %p788_p9 = scmp.lt.u32.totalorder %s993_s29, %s1044_s9 }
 0x30b   : > { %p789_p10 = scmp.lt.u32.totalorder %s787_s24, %s783_s18  ;;  %p791_p12 = scmp.lt.u32.totalorder %s783_s18, %s993_s29 }
 0x30c   : > { %p785_p7 = pnand %p784_p4, %p929_p5 }
 0x30d   : > { %p790_p11 = por %p789_p10, %p788_p9 }
 0x30e   : > { %p786_p8 = pneg %p785_p7 }
 0x30f   : > { %p792_p13 = por %p791_p12, %p790_p11 }
 0x311   : > { %p793_p0 = pnand %p792_p13, %p786_p8 }
 0x313   : > { %796 = shalt.err (!%p793_p0)
}
 0x314   : > { %716 = dma.vmem_to_hbm [thread:$0]  (%p929_p5), %s995_s26, 16, %s993_s29, %s590_s30  }
 0x315 PF: > { %p722_p1 = scmp.ge.s32.totalorder %s831_s14, 2  ;;  %s614_s28 = sand.u32 1, %s819_s11  }
 0x316   : > { %s615_s10 = scalar_lea.sflag [#allocation4], %s614_s28 }
 0x317   : > { %p719_p2 = pnand %p722_p1, %p933_p6 }
 0x319   : > { %814 = dma.done.wait (!%p719_p2), %s615_s10, 16  }
 0x31a   : > { %816 = vsyncadd (!%p719_p2), %s615_s10, 4294967280  ;;  %p21_p3 = scmp.ge.s32.totalorder %s916_s16, 4   ;;  %s1047_s11 = smov %s823_s12 }
 0x31b   : > { %s1048_s12 = smov %s827_s13  ;;  %s1049_s13 = smov %s927_s19 }
 0x31c   : > { %s1050_s14 = smov %s916_s16  ;;  %23 = sbr.rel (!%p21_p3) target bundleno = 6 (0x6), region = 94 }
 0x323   :  { %619 = vsyncpa [#allocation4], 1 }
 0x324   :  { %621 = vsyncpa [#allocation4 + $0x1], 1 }

</bundles_post_ra>
